<compile_context>
chip_gen: v7x
topology: tpu7x:2x2x1
jax: 0.10.0
libtpu: 0.0.40
codegen_flags: <defaults>
</compile_context>

<pallas_src>
import jax
import jax.numpy as jnp
from jax.experimental import pallas as pl
from jax.experimental.pallas import tpu as pltpu

EPS = 1e-5


def _choose_cblk(N, C, HW, target_block_bytes=12 << 20):
    """Channels per grid step.

    Valid values are C itself or a multiple of 8 that divides C (keeps the
    (N, Cblk, HW) / (Cblk, 1) blocks inside Mosaic's (8, 128) tiling rule when
    Cblk != C).  The target keeps the double-buffered in+out footprint well
    under v7x's 64 MiB VMEM (review: <= ~40-48 MiB total).
    """
    per_c = 5 * N * HW * 4  # f32 bytes per channel per step: input (HW) + output (4*HW)
    if C * per_c <= target_block_bytes:
        # Whole channel dim fits in one block.  Prefer >=2 grid steps when an
        # aligned split keeps each step reasonably large (v7x: 2 TensorCores
        # share the grid); for tiny C (e.g. the test's C=4) use one step.
        half = C // 2
        if C % 2 == 0 and half % 8 == 0 and half * per_c >= (256 << 10):
            return half
        return C
    best = None
    for cand in range(8, C, 8):
        if C % cand == 0 and cand * per_c <= target_block_bytes:
            best = cand
    if best is not None:
        return best
    return 8 if C % 8 == 0 else C  # fallback (may exceed target for odd C)


def _decoder_block_kernel(g1_ref, g2_ref, b2_ref, dup_ref, x_ref, o_ref):
    """Fused (BN2 ∘ BN1 ∘ nearest-2x-upsample) on a (N, Cblk, H*W) block.

    g1_ref/g2_ref/b2_ref: (Cblk, 1) f32 affine params for this channel block.
    dup_ref:              (H*W, 4*H*W) f32 0/1 duplication matrix (resident).
    x_ref:                (N, Cblk, H*W)   block of the ORIGINAL tensor.
    o_ref:                (N, Cblk, 4*H*W) block of the flattened output.
    """
    x = x_ref[...].astype(jnp.float32)          # (N, Cblk, HW)
    n_b, cblk, hw = x.shape
    inv_m = 1.0 / float(n_b * hw)

    # --- Per-channel batch stats of the original tensor (== stats of the 2x
    # nearest-upsampled tensor since every element is repeated 4x).
    # Two-pass mean/var: no E[x^2]-E[x]^2 cancellation.
    mean = jnp.sum(jnp.sum(x, axis=2, keepdims=True), axis=0, keepdims=True) * inv_m
    xc = x - mean                                # (N, Cblk, HW)
    var = jnp.sum(jnp.sum(xc * xc, axis=2, keepdims=True), axis=0, keepdims=True) * inv_m

    # --- Analytic fold of BN2 into BN1 (training-mode batch stats):
    #   y1 = (x - mean)*rsqrt(var+eps)*g1 + b1
    #   mean(y1) = b1 (exact), var(y1) = g1^2 * var/(var+eps)
    #   => y2 = (x - mean)*scale + b2   (b1 cancels exactly)
    g1 = g1_ref[...].reshape(1, cblk, 1)
    g2 = g2_ref[...].reshape(1, cblk, 1)
    b2 = b2_ref[...].reshape(1, cblk, 1)
    inv1 = jax.lax.rsqrt(var + EPS)
    var2 = (g1 * g1) * var * (inv1 * inv1)       # g1^2 * var/(var+eps), keeps eps exact
    inv2 = jax.lax.rsqrt(var2 + EPS)
    scale = g1 * g2 * inv1 * inv2
    y = xc * scale + b2                          # (N, Cblk, HW)

    # --- Fused 2x nearest upsample: one batched 0/1 duplication matmul that
    # writes the flattened (lane-dense, 128-aligned) output rows directly.
    # out[r, (2i+di)*2W + 2j+dj] = y[r, i*W + j]; each column of dup has
    # exactly one 1.0, so the f32 matmul is exact.
    y2 = y.reshape(n_b * cblk, hw)
    up = jnp.dot(y2, dup_ref[...], preferred_element_type=jnp.float32)  # (N*Cblk, 4*HW)
    o_ref[...] = up.reshape(n_b, cblk, 4 * hw).astype(o_ref.dtype)


def decoder_block_forward(x_nchw, g1, b1, g2, b2):
    """x_nchw: (N, C, H, W). Returns (N, C, 2H, 2W) float32, like the module.

    b1 is accepted for signature parity but cancels exactly in the analytic
    BN2∘BN1 fold (the batch mean of the second BN's input equals b1).
    """
    del b1
    N, C, H, W = x_nchw.shape
    HW = H * W
    H2W2 = 4 * HW
    W2 = 2 * W

    cblk = _choose_cblk(N, C, HW)
    grid = (C // cblk,)

    # Free metadata reshapes of contiguous NCHW: lane-dense last dims.
    x_flat = x_nchw.reshape(N, C, HW)            # cast to f32 happens in-kernel
    g1f = jnp.asarray(g1, jnp.float32).reshape(C, 1)
    g2f = jnp.asarray(g2, jnp.float32).reshape(C, 1)
    b2f = jnp.asarray(b2, jnp.float32).reshape(C, 1)

    # 0/1 nearest-2x duplication matrix (built once, resident in VMEM).
    # dup[s, t] = 1 iff flat output position t = (2i+di)*W2 + (2j+dj)
    # duplicates flat input position s = i*W + j.
    # TODO(synk): dup scales as 4*(H*W)^2 floats; for large spatial extents
    # factor it into separate H / W duplication matmuls instead.
    s = jnp.arange(HW, dtype=jnp.int32)
    si, sj = s // W, s % W
    t = jnp.arange(H2W2, dtype=jnp.int32)
    ti, tj = t // W2, t % W2
    dup = ((ti[None, :] // 2 == si[:, None]) &
           (tj[None, :] // 2 == sj[:, None])).astype(jnp.float32)   # (HW, 4*HW)

    grid_spec = pltpu.PrefetchScalarGridSpec(
        num_scalar_prefetch=0,
        grid=grid,                                   # one step per channel block
        in_specs=[
            pl.BlockSpec((cblk, 1), lambda i: (i, 0)),       # g1
            pl.BlockSpec((cblk, 1), lambda i: (i, 0)),       # g2
            pl.BlockSpec((cblk, 1), lambda i: (i, 0)),       # b2
            pl.BlockSpec((HW, H2W2), lambda i: (0, 0)),      # dup (constant index -> resident)
            pl.BlockSpec((N, cblk, HW), lambda i: (0, i, 0)),
        ],
        out_specs=pl.BlockSpec((N, cblk, H2W2), lambda i: (0, i, 0)),
    )

    # VMEM budget: double-buffered in+out blocks + resident dup + slack.
    # Capped at 48 MiB so the same config is safe on v7x (64 MiB VMEM).
    step_bytes = N * cblk * (HW + H2W2) * 4
    dup_bytes = HW * H2W2 * 4
    vmem_limit = int(min(48 << 20, max(32 << 20, 2 * step_bytes + 2 * dup_bytes + (4 << 20))))

    bytes_accessed = 4 * (N * C * HW + N * C * H2W2 + HW * H2W2 + 3 * C)
    flops = 2 * N * C * HW * H2W2 + 10 * N * C * HW

    out_flat = pl.pallas_call(
        _decoder_block_kernel,
        grid_spec=grid_spec,
        out_shape=jax.ShapeDtypeStruct((N, C, H2W2), jnp.float32),
        compiler_params=pltpu.CompilerParams(
            dimension_semantics=("parallel",),   # channel blocks are independent
            vmem_limit_bytes=vmem_limit,
        ),
        cost_estimate=pl.CostEstimate(
            flops=int(flops), transcendentals=0, bytes_accessed=int(bytes_accessed)),
    )(g1f, g2f, b2f, dup, x_flat)

    return out_flat.reshape(N, C, 2 * H, 2 * W)   # free metadata reshape back to NCHW


def _reference(x_nchw, g1, b1, g2, b2):
    """Pure-JAX reference of the module's forward (upsample + 2x training BN)."""
    x = jnp.repeat(jnp.repeat(x_nchw, 2, axis=2), 2, axis=3)

    def bn(t, g, b):
        m = jnp.mean(t, axis=(0, 2, 3), keepdims=True)
        v = jnp.mean((t - m) ** 2, axis=(0, 2, 3), keepdims=True)
        gg = jnp.asarray(g).reshape(1, -1, 1, 1)
        bb = jnp.asarray(b).reshape(1, -1, 1, 1)
        return (t - m) * jax.lax.rsqrt(v + EPS) * gg + bb

    return bn(bn(x, g1, b1), g2, b2)


if __name__ == "__main__":
    # DecoderBlock(in_channels=4, skip_channels=0, out_channels=4)
    N, C, H, W = 2, 4, 16, 16
    key = jax.random.PRNGKey(0)
    kx, k1, k2, k3, k4 = jax.random.split(key, 5)

    x = jax.random.normal(kx, (N, C, H, W), dtype=jnp.float32)
    g1 = 1.0 + 0.1 * jax.random.normal(k1, (C,), dtype=jnp.float32)
    b1 = 0.1 * jax.random.normal(k2, (C,), dtype=jnp.float32)
    g2 = 1.0 + 0.1 * jax.random.normal(k3, (C,), dtype=jnp.float32)
    b2 = 0.1 * jax.random.normal(k4, (C,), dtype=jnp.float32)

    out = decoder_block_forward(x, g1, b1, g2, b2)
    out = jax.block_until_ready(out)

    ref = _reference(x, g1, b1, g2, b2)
    assert out.shape == (N, C, 2 * H, 2 * W), out.shape
    max_err = float(jnp.max(jnp.abs(out - ref)))
    assert jnp.allclose(out, ref, atol=1e-4, rtol=1e-4), max_err

    print("KERNEL_OK")
</pallas_src>

<mosaic_0001>
module attributes {stable_mosaic.version = 11 : i64} {
  func.func @_decoder_block_kernel(%arg0: i32, %arg1: memref<4x1xf32, #tpu.memory_space<vmem>>, %arg2: memref<4x1xf32, #tpu.memory_space<vmem>>, %arg3: memref<4x1xf32, #tpu.memory_space<vmem>>, %arg4: memref<256x1024xf32, #tpu.memory_space<vmem>>, %arg5: memref<2x4x256xf32, #tpu.memory_space<vmem>>, %arg6: memref<2x4x1024xf32, #tpu.memory_space<vmem>>) attributes {dimension_semantics = [#tpu.dimension_semantics<parallel>], iteration_bounds = array<i64: 1>, scalar_prefetch = 0 : i64, scratch_operands = 0 : i64, tpu.core_type = #tpu.core_type<tc>, window_params = [{transform_indices = @transform_0, window_bounds = array<i64: 4, 1>}, {transform_indices = @transform_1, window_bounds = array<i64: 4, 1>}, {transform_indices = @transform_2, window_bounds = array<i64: 4, 1>}, {pipeline_mode = #tpu.pipeline_mode<synchronous>, transform_indices = @transform_3, window_bounds = array<i64: 256, 1024>}, {transform_indices = @transform_4, window_bounds = array<i64: 2, 4, 256>}, {transform_indices = @transform_5, window_bounds = array<i64: 2, 4, 1024>}]} {
    %c0 = arith.constant 0 : index
    %c0_0 = arith.constant 0 : index
    %c0_1 = arith.constant 0 : index
    %0 = vector.load %arg5[%c0, %c0_0, %c0_1] : memref<2x4x256xf32, #tpu.memory_space<vmem>>, vector<2x4x256xf32>
    %cst = arith.constant dense<0.000000e+00> : vector<2x4xf32>
    %1 = vector.multi_reduction <add>, %0, %cst [2] : vector<2x4x256xf32> to vector<2x4xf32>
    %2 = vector.shape_cast %1 : vector<2x4xf32> to vector<2x4x1xf32>
    %cst_2 = arith.constant dense<0.000000e+00> : vector<4x1xf32>
    %3 = vector.multi_reduction <add>, %2, %cst_2 [0] : vector<2x4x1xf32> to vector<4x1xf32>
    %4 = vector.shape_cast %3 : vector<4x1xf32> to vector<1x4x1xf32>
    %cst_3 = arith.constant 0.001953125 : f32
    %5 = vector.broadcast %cst_3 : f32 to vector<1x4x1xf32>
    %6 = arith.mulf %4, %5 : vector<1x4x1xf32>
    %7 = vector.broadcast %6 : vector<1x4x1xf32> to vector<2x4x256xf32>
    %8 = arith.subf %0, %7 : vector<2x4x256xf32>
    %9 = arith.mulf %8, %8 : vector<2x4x256xf32>
    %cst_4 = arith.constant dense<0.000000e+00> : vector<2x4xf32>
    %10 = vector.multi_reduction <add>, %9, %cst_4 [2] : vector<2x4x256xf32> to vector<2x4xf32>
    %11 = vector.shape_cast %10 : vector<2x4xf32> to vector<2x4x1xf32>
    %cst_5 = arith.constant dense<0.000000e+00> : vector<4x1xf32>
    %12 = vector.multi_reduction <add>, %11, %cst_5 [0] : vector<2x4x1xf32> to vector<4x1xf32>
    %13 = vector.shape_cast %12 : vector<4x1xf32> to vector<1x4x1xf32>
    %cst_6 = arith.constant 0.001953125 : f32
    %14 = vector.broadcast %cst_6 : f32 to vector<1x4x1xf32>
    %15 = arith.mulf %13, %14 : vector<1x4x1xf32>
    %c0_7 = arith.constant 0 : index
    %c0_8 = arith.constant 0 : index
    %16 = vector.load %arg1[%c0_7, %c0_8] : memref<4x1xf32, #tpu.memory_space<vmem>>, vector<4x1xf32>
    %17 = vector.shape_cast %16 : vector<4x1xf32> to vector<1x4x1xf32>
    %c0_9 = arith.constant 0 : index
    %c0_10 = arith.constant 0 : index
    %18 = vector.load %arg2[%c0_9, %c0_10] : memref<4x1xf32, #tpu.memory_space<vmem>>, vector<4x1xf32>
    %19 = vector.shape_cast %18 : vector<4x1xf32> to vector<1x4x1xf32>
    %c0_11 = arith.constant 0 : index
    %c0_12 = arith.constant 0 : index
    %20 = vector.load %arg3[%c0_11, %c0_12] : memref<4x1xf32, #tpu.memory_space<vmem>>, vector<4x1xf32>
    %21 = vector.shape_cast %20 : vector<4x1xf32> to vector<1x4x1xf32>
    %cst_13 = arith.constant 9.99999974E-6 : f32
    %22 = vector.broadcast %cst_13 : f32 to vector<1x4x1xf32>
    %23 = arith.addf %15, %22 : vector<1x4x1xf32>
    %24 = math.rsqrt %23 : vector<1x4x1xf32>
    %25 = arith.mulf %17, %17 : vector<1x4x1xf32>
    %26 = arith.mulf %25, %15 : vector<1x4x1xf32>
    %27 = arith.mulf %24, %24 : vector<1x4x1xf32>
    %28 = arith.mulf %26, %27 : vector<1x4x1xf32>
    %cst_14 = arith.constant 9.99999974E-6 : f32
    %29 = vector.broadcast %cst_14 : f32 to vector<1x4x1xf32>
    %30 = arith.addf %28, %29 : vector<1x4x1xf32>
    %31 = math.rsqrt %30 : vector<1x4x1xf32>
    %32 = arith.mulf %17, %19 : vector<1x4x1xf32>
    %33 = arith.mulf %32, %24 : vector<1x4x1xf32>
    %34 = arith.mulf %33, %31 : vector<1x4x1xf32>
    %35 = vector.broadcast %34 : vector<1x4x1xf32> to vector<2x4x256xf32>
    %36 = arith.mulf %8, %35 : vector<2x4x256xf32>
    %37 = vector.broadcast %21 : vector<1x4x1xf32> to vector<2x4x256xf32>
    %38 = arith.addf %36, %37 : vector<2x4x256xf32>
    %39 = vector.shape_cast %38 : vector<2x4x256xf32> to vector<8x256xf32>
    %c0_15 = arith.constant 0 : index
    %c0_16 = arith.constant 0 : index
    %40 = vector.load %arg4[%c0_15, %c0_16] : memref<256x1024xf32, #tpu.memory_space<vmem>>, vector<256x1024xf32>
    %cst_17 = arith.constant dense<0.000000e+00> : vector<8x1024xf32>
    %41 = tpu.matmul %39, %40, %cst_17 {dimension_numbers = #tpu.dot_dimension_numbers<[1], [0], [0], [1], [0, 0, 1, 1], [], []>} : vector<8x256xf32>, vector<256x1024xf32>, vector<8x1024xf32> -> vector<8x1024xf32>
    %42 = vector.shape_cast %41 : vector<8x1024xf32> to vector<2x4x1024xf32>
    %c0_18 = arith.constant 0 : index
    %c0_19 = arith.constant 0 : index
    %c0_20 = arith.constant 0 : index
    %43 = vector.load %arg6[%c0_18, %c0_19, %c0_20] : memref<2x4x1024xf32, #tpu.memory_space<vmem>>, vector<2x4x1024xf32>
    tpu.vector_store %arg6[%c0_18, %c0_19, %c0_20], %42 {strides = array<i32>} : memref<2x4x1024xf32, #tpu.memory_space<vmem>>, vector<2x4x1024xf32>,
    return
  }
  func.func @transform_0(%arg0: i32) -> (i32, i32) {
    %c0_i32 = arith.constant 0 : i32
    %c0_i32_0 = arith.constant 0 : i32
    return %arg0, %c0_i32 : i32, i32
  }
  func.func @transform_1(%arg0: i32) -> (i32, i32) {
    %c0_i32 = arith.constant 0 : i32
    %c0_i32_0 = arith.constant 0 : i32
    return %arg0, %c0_i32 : i32, i32
  }
  func.func @transform_2(%arg0: i32) -> (i32, i32) {
    %c0_i32 = arith.constant 0 : i32
    %c0_i32_0 = arith.constant 0 : i32
    return %arg0, %c0_i32 : i32, i32
  }
  func.func @transform_3(%arg0: i32) -> (i32, i32) {
    %c0_i32 = arith.constant 0 : i32
    %c0_i32_0 = arith.constant 0 : i32
    %c0_i32_1 = arith.constant 0 : i32
    return %c0_i32, %c0_i32_0 : i32, i32
  }
  func.func @transform_4(%arg0: i32) -> (i32, i32, i32) {
    %c0_i32 = arith.constant 0 : i32
    %c0_i32_0 = arith.constant 0 : i32
    %c0_i32_1 = arith.constant 0 : i32
    return %c0_i32, %arg0, %c0_i32_0 : i32, i32, i32
  }
  func.func @transform_5(%arg0: i32) -> (i32, i32, i32) {
    %c0_i32 = arith.constant 0 : i32
    %c0_i32_0 = arith.constant 0 : i32
    %c0_i32_1 = arith.constant 0 : i32
    return %c0_i32, %arg0, %c0_i32_0 : i32, i32, i32
  }
}

</mosaic_0001>

<bundles_post_ra>
// kernel: tpu_custom_call.1
= control target key start
LH: loop header
LB: loop body
LE: loop exit
PB: predicated region body
PF: predicated region fallthrough
CT: control target
= control target key end

     0   :  { %10 = vsyncpa [#allocation3], 0  ;;  %s1158_s0 = inlined_call_operand.vmem [shape: f32[4,1], index: 0, kind: input, shape index: {}]   ;;  %s1159_s1 = inlined_call_operand.vmem [shape: f32[4,1], index: 1, kind: input, shape index: {}]   ;;  %s1160_s2 = inlined_call_operand.vmem [shape: f32[4,1], index: 2, kind: input, shape index: {}]   ;;  %s1161_s3 = inlined_call_operand.hbm [shape: f32[256,1024], index: 3, kind: input, shape index: {}]   ;;  %s1162_s4 = inlined_call_operand.vmem [shape: f32[2,4,256], index: 4, kind: input, shape index: {}]   ;;  %s1163_s5 = inlined_call_operand.hbm [shape: f32[2,4,1024], index: 5, kind: output, shape index: {}]  }
   0x1   :  { %11 = vsyncpa [#allocation4], 0  ;;  %s1048_s18 = smov [#allocation2]   ;;  %s1000_s22 = scalar_lea.hbm %s1161_s3, 32768 }
   0x2   :  { %s23_s19 = sshll.u32 %s1048_s18, 4  ;;  %p1001_p0 = scmp.ne.s32.totalorder %s1161_s3, %s1000_s22  ;;  %s24_s19 = int_to_ptr.vmem [resolvable:$true] %s23_s19 }
   0x3   :  { %p1004_p1 = scmp.lt.u32.totalorder %s1000_s22, %s1161_s3 }
   0x5   :  { %p1006_p2 = pnand %p1004_p1, %p1001_p0 }
   0x7   :  { %1009 = shalt.err (!%p1006_p2)
}
   0x8   :  { %s1010_s27 = scalar_lea.vmem %s24_s19, 32768  ;;  %p1015_p4 = scmp.lt.s32.totalorder %s24_s19, %s24_s19 }
   0x9   :  { %p1011_p3 = scmp.ne.s32.totalorder %s24_s19, %s1010_s27  ;;  %p1016_p5 = scmp.lt.s32.totalorder %s1010_s27, %s1010_s27 }
   0xb   :  { %p1017_p6 = por %p1016_p5, %p1015_p4 }
   0xd   :  { %p1018_p7 = pnand %p1017_p6, %p1011_p3 }
   0xf   :  { %1021 = shalt.err (!%p1018_p7)
}
  0x10   :  { %s1049_s28 = smov 1024   ;;  %s1050_s29 = smov 64  }
  0x11   :  { %29 = dma.hbm_to_vmem [thread:$0]  %s1161_s3, 32768, %s24_s19, [#allocation3], %s1049_s28, %s1049_s28, %s1050_s29  }
  0x12   :  { %1044 = dma.done.wait [#allocation3], 32768  }
  0x13   :  { %1045 = vsyncadd [#allocation3], 4294934528  ;;  %vm43_vm0 = vcmask 1043456   ;;  %v35_v0 = vld [vmem:[%s1162_s4] sm:$0xff]  ;;  %v36_v1 = vld [vmem:[%s1162_s4 + $0x8] sm:$0xff]  ;;  %v62_v12 = vlaneseq  ;;  %v1052_v35 = vmov 0  }
  0x14   :  { %v39_v2 = vcombine.high %v35_v0, %v35_v0  ;;  %v44_v3 = vsel %vm43_vm0, %v35_v0, 0.0  ;;  %v40_v4 = vcombine.high %v36_v1, %v36_v1  ;;  %v49_v6 = vsel %vm43_vm0, %v36_v1, 0.0  ;;  %992 = vset.pattern.permute.xlu0 %v1052_v35  ;;  %993 = vset.pattern.permute.xlu1 %v1052_v35  ;;  %v93_v36 = vld [vmem:[%s1160_s2] sm:$0xf]  ;;  %v134_v37 = vld [vmem:[#allocation2 + $0x8] sm:$0xff]  ;;  %v136_v40 = vld [vmem:[#allocation2 + $0x18] sm:$0xff] }
  0x15   :  { %v1051_v10 = vmov 839922192   ;;  %v63_v15 = vshrl.u32 %v62_v12, 7  ;;  %v142_v38 = vld [vmem:[#allocation2 + $0x48] sm:$0xff]  ;;  %v144_v41 = vld [vmem:[#allocation2 + $0x58] sm:$0xff]  ;;  %v133_v42 = vld [vmem:[#allocation2] sm:$0xff] }
  0x16   :  { %v45_v5 = vsel %vm43_vm0, %v39_v2, 0.0  ;;  %v50_v7 = vsel %vm43_vm0, %v40_v4, 0.0  ;;  %v60_v11 = vunpack.c.l.s4 %v1051_v10  ;;  %v728_v39 = vpack.c.bf16 %v142_v38, %v134_v37  ;;  %v141_v44 = vld [vmem:[#allocation2 + $0x40] sm:$0xff]  ;;  %v135_v45 = vld [vmem:[#allocation2 + $0x10] sm:$0xff]  ;;  %v150_v49 = vld [vmem:[#allocation2 + $0x88] sm:$0xff] }
  0x17   :  { %v46_v8 = vadd.f32 %v45_v5, %v44_v3  ;;  %v51_v9 = vadd.f32 %v50_v7, %v49_v6  ;;  %v792_v43 = vpack.c.bf16 %v144_v41, %v136_v40  ;;  %v143_v46 = vld [vmem:[#allocation2 + $0x50] sm:$0xff]  ;;  %v730_v47 = vpack.c.bf16 %v141_v44, %v133_v42  ;;  %v158_v50 = vld [vmem:[#allocation2 + $0xc8] sm:$0xff]  ;;  %v152_v51 = vld [vmem:[#allocation2 + $0x98] sm:$0xff] }
  0x18   :  { %v61_v14 = vunpack.c.0.s8 %v60_v11  ;;  %729 = vmatprep.subr.bf16.mxu0 %v728_v39  ;;  %v794_v48 = vpack.c.bf16 %v143_v46, %v135_v45  ;;  %v732_v52 = vpack.c.bf16 %v158_v50, %v150_v49  ;;  %v160_v53 = vld [vmem:[#allocation2 + $0xd8] sm:$0xff]  ;;  %v149_v54 = vld [vmem:[#allocation2 + $0x80] sm:$0xff]  ;;  %v151_v58 = vld [vmem:[#allocation2 + $0x90] sm:$0xff] }
  0x19   :  { %47 = vadd.xlane.f32.xlu0 %v46_v8  ;;  %793 = vmatprep.subr.bf16.mxu1 %v792_v43  ;;  %v157_v55 = vld [vmem:[#allocation2 + $0xc0] sm:$0xff]  ;;  %v796_v56 = vpack.c.bf16 %v160_v53, %v152_v51  ;;  %v159_v59 = vld [vmem:[#allocation2 + $0xd0] sm:$0xff]  ;;  %v166_v60 = vld [vmem:[#allocation2 + $0x108] sm:$0xff] }
  0x1a   :  { %v1110_v19 = vsub.s32 %v61_v14, %v63_v15  ;;  %731 = vmatpush1.bf16.msra.mxu0 %v730_v47  ;;  %795 = vmatpush1.bf16.msra.mxu1 %v794_v48  ;;  %v734_v57 = vpack.c.bf16 %v157_v55, %v149_v54  ;;  %v798_v61 = vpack.c.bf16 %v159_v59, %v151_v58  ;;  %v174_v62 = vld [vmem:[#allocation2 + $0x148] sm:$0xff]  ;;  %v168_v63 = vld [vmem:[#allocation2 + $0x118] sm:$0xff]  ;;  %v165_v3 = vld [vmem:[#allocation2 + $0x100] sm:$0xff] }
  0x1b   :  { %733 = vmatprep.subr.bf16.mxu0 %v732_v52  ;;  %797 = vmatprep.subr.bf16.mxu1 %v796_v56  ;;  %v173_v4 = vld [vmem:[#allocation2 + $0x140] sm:$0xff]  ;;  %v167_v5 = vld [vmem:[#allocation2 + $0x110] sm:$0xff]  ;;  %v182_v7 = vld [vmem:[#allocation2 + $0x188] sm:$0xff] }
  0x1c   :  { %v175_v6 = vld [vmem:[#allocation2 + $0x150] sm:$0xff]  ;;  %v190_v8 = vld [vmem:[#allocation2 + $0x1c8] sm:$0xff]  ;;  %v184_v11 = vld [vmem:[#allocation2 + $0x198] sm:$0xff] }
  0x1d   :  { %52 = vadd.xlane.f32.xlu0 %v51_v9  ;;  %v738_v9 = vpack.c.bf16 %v173_v4, %v165_v3  ;;  %v802_v10 = vpack.c.bf16 %v175_v6, %v167_v5  ;;  %v192_v12 = vld [vmem:[#allocation2 + $0x1d8] sm:$0xff]  ;;  %v740_v14 = vpack.c.bf16 %v190_v8, %v182_v7  ;;  %v222_v35 = vld [vmem:[#allocation2 + $0x2c8] sm:$0xff]  ;;  %v213_v40 = vld [vmem:[#allocation2 + $0x280] sm:$0xff] }
  0x1e   :  { %735 = vmatpush1.bf16.msra.mxu0 %v734_v57  ;;  %799 = vmatpush1.bf16.msra.mxu1 %v798_v61  ;;  %v804_v15 = vpack.c.bf16 %v192_v12, %v184_v11  ;;  %v224_v37 = vld [vmem:[#allocation2 + $0x2d8] sm:$0xff]  ;;  %v221_v41 = vld [vmem:[#allocation2 + $0x2c0] sm:$0xff]  ;;  %v215_v44 = vld [vmem:[#allocation2 + $0x290] sm:$0xff] }
  0x1f   :  { %v223_v45 = vld [vmem:[#allocation2 + $0x2d0] sm:$0xff]  ;;  %v230_v46 = vld [vmem:[#allocation2 + $0x308] sm:$0xff]  ;;  %v232_v48 = vld [vmem:[#allocation2 + $0x318] sm:$0xff]  ;;  %v750_v50 = vpack.c.bf16 %v221_v41, %v213_v40 }
  0x20   :  { %v238_v47 = vld [vmem:[#allocation2 + $0x348] sm:$0xff]  ;;  %v240_v49 = vld [vmem:[#allocation2 + $0x358] sm:$0xff]  ;;  %v814_v51 = vpack.c.bf16 %v223_v45, %v215_v44  ;;  %v229_v52 = vld [vmem:[#allocation2 + $0x300] sm:$0xff] }
  0x21   :  { %v237_v53 = vld [vmem:[#allocation2 + $0x340] sm:$0xff]  ;;  %v752_v54 = vpack.c.bf16 %v238_v47, %v230_v46  ;;  %v816_v55 = vpack.c.bf16 %v240_v49, %v232_v48  ;;  %v231_v56 = vld [vmem:[#allocation2 + $0x310] sm:$0xff]  ;;  %v246_v58 = vld [vmem:[#allocation2 + $0x388] sm:$0xff] }
  0x22   :  { %v239_v57 = vld [vmem:[#allocation2 + $0x350] sm:$0xff]  ;;  %v254_v59 = vld [vmem:[#allocation2 + $0x3c8] sm:$0xff]  ;;  %v256_v61 = vld [vmem:[#allocation2 + $0x3d8] sm:$0xff] }
  0x23   :  { %v247_v4 = vld [vmem:[#allocation2 + $0x390] sm:$0xff]  ;;  %v262_v6 = vld [vmem:[#allocation2 + $0x408] sm:$0xff]  ;;  %v264_v8 = vld [vmem:[#allocation2 + $0x418] sm:$0xff] }
  0x24   :  { %v255_v5 = vld [vmem:[#allocation2 + $0x3d0] sm:$0xff]  ;;  %v270_v7 = vld [vmem:[#allocation2 + $0x448] sm:$0xff]  ;;  %v261_v12 = vld [vmem:[#allocation2 + $0x400] sm:$0xff] }
  0x25   :  { %v822_v11 = vpack.c.bf16 %v255_v5, %v247_v4  ;;  %v301_v40 = vld [vmem:[#allocation2 + $0x540] sm:$0xff]  ;;  %v303_v44 = vld [vmem:[#allocation2 + $0x550] sm:$0xff]  ;;  %v310_v45 = vld [vmem:[#allocation2 + $0x588] sm:$0xff] }
  0x26   :  { %v318_v46 = vld [vmem:[#allocation2 + $0x5c8] sm:$0xff]  ;;  %v312_v47 = vld [vmem:[#allocation2 + $0x598] sm:$0xff]  ;;  %v335_v4 = vld [vmem:[#allocation2 + $0x650] sm:$0xff] }
  0x27   :  { %v320_v48 = vld [vmem:[#allocation2 + $0x5d8] sm:$0xff]  ;;  %v342_v5 = vld [vmem:[#allocation2 + $0x688] sm:$0xff] }
  0xa6   :  { %v48_v13 = vpop.xlane.xlu0 %47 }
  0xa7   :  { %v54_v17 = vsel %vm43_vm0, %v48_v13, 0.0  ;;  %v181_v13 = vld [vmem:[#allocation2 + $0x180] sm:$0xff] }
  0xaa   :  { %v53_v16 = vpop.xlane.xlu0 %52 }
  0xab   :  { %v55_v18 = vsel %vm43_vm0, %v53_v16, 0.0  ;;  %v189_v16 = vld [vmem:[#allocation2 + $0x1c0] sm:$0xff] }
  0xac   :  { %v56_v20 = vadd.f32 %v55_v18, %v54_v17  ;;  %v183_v17 = vld [vmem:[#allocation2 + $0x190] sm:$0xff] }
  0xad   :  { %v191_v18 = vld [vmem:[#allocation2 + $0x1d0] sm:$0xff] }
  0xae   :  { %v57_v21 = vmul.f32 0.001953125, %v56_v20  ;;  %v198_v20 = vld [vmem:[#allocation2 + $0x208] sm:$0xff] }
  0xb0   :  { %v65_v22 = vrot.slane %v57_v21, %v1110_v19  ;;  %v206_v21 = vld [vmem:[#allocation2 + $0x248] sm:$0xff] }
  0xb2   :  { %v1113_v23 = vsub.f32 %v36_v1, %v65_v22  ;;  %v1115_v24 = vsub.f32 %v35_v0, %v65_v22  ;;  %v176_v0 = vld [vmem:[#allocation2 + $0x158] sm:$0xff]  ;;  %v736_v1 = vpack.c.bf16 %v174_v62, %v166_v60  ;;  %v754_v62 = vpack.c.bf16 %v237_v53, %v229_v52  ;;  %v317_v52 = vld [vmem:[#allocation2 + $0x5c0] sm:$0xff] }
  0xb3   :  { %v800_v2 = vpack.c.bf16 %v176_v0, %v168_v63  ;;  %v200_v22 = vld [vmem:[#allocation2 + $0x218] sm:$0xff]  ;;  %v818_v63 = vpack.c.bf16 %v239_v57, %v231_v56  ;;  %v245_v0 = vld [vmem:[#allocation2 + $0x380] sm:$0xff]  ;;  %v772_v53 = vpack.c.bf16 %v318_v46, %v310_v45  ;;  %v319_v56 = vld [vmem:[#allocation2 + $0x5d0] sm:$0xff] }
  0xb4   :  { %v69_v25 = vmul.f32 %v1115_v24, %v1115_v24  ;;  %v70_v26 = vmul.f32 %v1113_v23, %v1113_v23  ;;  %737 = vmatprep.subr.bf16.mxu0 %v736_v1  ;;  %v248_v60 = vld [vmem:[#allocation2 + $0x398] sm:$0xff]  ;;  %v253_v1 = vld [vmem:[#allocation2 + $0x3c0] sm:$0xff]  ;;  %v326_v57 = vld [vmem:[#allocation2 + $0x608] sm:$0xff] }
  0xb5   :  { %801 = vmatprep.subr.bf16.mxu1 %v800_v2  ;;  %739 = vmatpush1.bf16.msra.mxu0 %v738_v9  ;;  %v756_v2 = vpack.c.bf16 %v254_v59, %v246_v58  ;;  %v820_v3 = vpack.c.bf16 %v256_v61, %v248_v60  ;;  %v272_v9 = vld [vmem:[#allocation2 + $0x458] sm:$0xff]  ;;  %v334_v58 = vld [vmem:[#allocation2 + $0x648] sm:$0xff]  ;;  %v357_v46 = vld [vmem:[#allocation2 + $0x700] sm:$0xff] }
  0xb6   :  { %v73_v27 = vcombine.high %v69_v25, %v69_v25  ;;  %v74_v28 = vcombine.high %v70_v26, %v70_v26  ;;  %v77_v29 = vsel %vm43_vm0, %v69_v25, 0.0  ;;  %v82_v33 = vsel %vm43_vm0, %v70_v26, 0.0  ;;  %v208_v25 = vld [vmem:[#allocation2 + $0x258] sm:$0xff]  ;;  %803 = vmatpush1.bf16.msra.mxu1 %v802_v10  ;;  %741 = vmatprep.subr.bf16.mxu0 %v740_v14 }
  0xb7   :  { %v742_v26 = vpack.c.bf16 %v189_v16, %v181_v13  ;;  %805 = vmatprep.subr.bf16.mxu1 %v804_v15  ;;  %v758_v10 = vpack.c.bf16 %v253_v1, %v245_v0  ;;  %v269_v13 = vld [vmem:[#allocation2 + $0x440] sm:$0xff]  ;;  %v760_v14 = vpack.c.bf16 %v270_v7, %v262_v6  ;;  %v824_v15 = vpack.c.bf16 %v272_v9, %v264_v8  ;;  %v263_v16 = vld [vmem:[#allocation2 + $0x410] sm:$0xff]  ;;  %v328_v59 = vld [vmem:[#allocation2 + $0x618] sm:$0xff] }
  0xb8   :  { %v78_v30 = vsel %vm43_vm0, %v73_v27, 0.0  ;;  %v83_v32 = vsel %vm43_vm0, %v74_v28, 0.0  ;;  %v806_v27 = vpack.c.bf16 %v191_v18, %v183_v17  ;;  %v197_v28 = vld [vmem:[#allocation2 + $0x200] sm:$0xff]  ;;  %v271_v17 = vld [vmem:[#allocation2 + $0x450] sm:$0xff]  ;;  %v278_v18 = vld [vmem:[#allocation2 + $0x488] sm:$0xff]  ;;  %v776_v1 = vpack.c.bf16 %v334_v58, %v326_v57 }
  0xb9   :  { %v79_v31 = vadd.f32 %v78_v30, %v77_v29  ;;  %v84_v34 = vadd.f32 %v83_v32, %v82_v33  ;;  %v205_v29 = vld [vmem:[#allocation2 + $0x240] sm:$0xff]  ;;  %v744_v30 = vpack.c.bf16 %v206_v21, %v198_v20  ;;  %v199_v32 = vld [vmem:[#allocation2 + $0x210] sm:$0xff]  ;;  %743 = vmatpush1.bf16.msra.mxu0 %v742_v26  ;;  %v286_v20 = vld [vmem:[#allocation2 + $0x4c8] sm:$0xff]  ;;  %v826_v26 = vpack.c.bf16 %v271_v17, %v263_v16 }
  0xba   :  { %v207_v33 = vld [vmem:[#allocation2 + $0x250] sm:$0xff]  ;;  %807 = vmatpush1.bf16.msra.mxu1 %v806_v27  ;;  %v746_v38 = vpack.c.bf16 %v205_v29, %v197_v28  ;;  %v280_v21 = vld [vmem:[#allocation2 + $0x498] sm:$0xff]  ;;  %v277_v27 = vld [vmem:[#allocation2 + $0x480] sm:$0xff]  ;;  %v764_v29 = vpack.c.bf16 %v286_v20, %v278_v18 }
  0xbb   :  { %80 = vadd.xlane.f32.xlu1 %v79_v31  ;;  %v808_v31 = vpack.c.bf16 %v208_v25, %v200_v22  ;;  %v810_v39 = vpack.c.bf16 %v207_v33, %v199_v32  ;;  %745 = vmatprep.subr.bf16.mxu0 %v744_v30  ;;  %v288_v22 = vld [vmem:[#allocation2 + $0x4d8] sm:$0xff]  ;;  %v762_v25 = vpack.c.bf16 %v269_v13, %v261_v12  ;;  %v285_v28 = vld [vmem:[#allocation2 + $0x4c0] sm:$0xff]  ;;  %v287_v32 = vld [vmem:[#allocation2 + $0x4d0] sm:$0xff] }
  0xbc   :  { %v828_v30 = vpack.c.bf16 %v288_v22, %v280_v21  ;;  %v294_v33 = vld [vmem:[#allocation2 + $0x508] sm:$0xff]  ;;  %v336_v60 = vld [vmem:[#allocation2 + $0x658] sm:$0xff]  ;;  %v333_v0 = vld [vmem:[#allocation2 + $0x640] sm:$0xff] }
  0xbd   :  { %809 = vmatprep.subr.bf16.mxu1 %v808_v31  ;;  %747 = vmatpush1.bf16.msra.mxu0 %v746_v38  ;;  %v279_v31 = vld [vmem:[#allocation2 + $0x490] sm:$0xff]  ;;  %v350_v6 = vld [vmem:[#allocation2 + $0x6c8] sm:$0xff]  ;;  %v344_v7 = vld [vmem:[#allocation2 + $0x698] sm:$0xff] }
  0xbe   :  { %811 = vmatpush1.bf16.msra.mxu1 %v810_v39  ;;  %v830_v38 = vpack.c.bf16 %v287_v32, %v279_v31  ;;  %v293_v39 = vld [vmem:[#allocation2 + $0x500] sm:$0xff]  ;;  %v352_v8 = vld [vmem:[#allocation2 + $0x6d8] sm:$0xff]  ;;  %v780_v12 = vpack.c.bf16 %v350_v6, %v342_v5  ;;  %v351_v16 = vld [vmem:[#allocation2 + $0x6d0] sm:$0xff] }
  0xbf   :  { %85 = vadd.xlane.f32.xlu1 %v84_v34  ;;  %v214_v34 = vld [vmem:[#allocation2 + $0x288] sm:$0xff]  ;;  %v770_v49 = vpack.c.bf16 %v301_v40, %v293_v39  ;;  %v844_v13 = vpack.c.bf16 %v352_v8, %v344_v7  ;;  %v368_v45 = vld [vmem:[#allocation2 + $0x758] sm:$0xff]  ;;  %v373_v58 = vld [vmem:[#allocation2 + $0x780] sm:$0xff] }
  0xc0   :  { %v748_v42 = vpack.c.bf16 %v222_v35, %v214_v34  ;;  %v302_v34 = vld [vmem:[#allocation2 + $0x548] sm:$0xff]  ;;  %v296_v35 = vld [vmem:[#allocation2 + $0x518] sm:$0xff] }
  0xc1   :  { %v768_v41 = vpack.c.bf16 %v302_v34, %v294_v33  ;;  %v358_v40 = vld [vmem:[#allocation2 + $0x708] sm:$0xff]  ;;  %v384_v57 = vld [vmem:[#allocation2 + $0x7d8] sm:$0xff] }
  0xc2   :  { %749 = vmatprep.subr.bf16.mxu0 %v748_v42  ;;  %v148_v5 = vld [vmem:[#allocation2 + $0x78] sm:$0xff] }
  0xc3   :  { %751 = vmatpush1.bf16.msra.mxu0 %v750_v50 }
  0xc4   :  { %753 = vmatprep.subr.bf16.mxu0 %v752_v54  ;;  %v836_v54 = vpack.c.bf16 %v320_v48, %v312_v47  ;;  %v365_v47 = vld [vmem:[#allocation2 + $0x740] sm:$0xff] }
  0xc7   :  { %755 = vmatpush1.bf16.msra.mxu0 %v754_v62 }
  0xc8   :  { %757 = vmatprep.subr.bf16.mxu0 %v756_v2  ;;  %v840_v2 = vpack.c.bf16 %v336_v60, %v328_v59  ;;  %v381_v59 = vld [vmem:[#allocation2 + $0x7c0] sm:$0xff] }
  0xcb   :  { %759 = vmatpush1.bf16.msra.mxu0 %v758_v10 }
  0xcc   :  { %761 = vmatprep.subr.bf16.mxu0 %v760_v14  ;;  %v349_v14 = vld [vmem:[#allocation2 + $0x6c0] sm:$0xff] }
  0xcf   :  { %763 = vmatpush1.bf16.msra.mxu0 %v762_v25 }
  0xd0   :  { %121 = vperm.xlu1 %993, %v93_v36   ;;  %v216_v36 = vld [vmem:[#allocation2 + $0x298] sm:$0xff]  ;;  %765 = vmatprep.subr.bf16.mxu0 %v764_v29  ;;  %v91_v29 = vld [vmem:[%s1158_s0] sm:$0xf]  ;;  %s1053_s0 = smov [#allocation5]  }
  0xd1   :  { %v812_v43 = vpack.c.bf16 %v224_v37, %v216_v36  ;;  %v304_v36 = vld [vmem:[#allocation2 + $0x558] sm:$0xff]  ;;  %v766_v37 = vpack.c.bf16 %v285_v28, %v277_v27 }
  0xd2   :  { %v832_v42 = vpack.c.bf16 %v304_v36, %v296_v35  ;;  %v92_v36 = vld [vmem:[%s1159_s1] sm:$0xf]  ;;  %s716_s1 = sshll.u32 %s1053_s0, 4  ;;  %s717_s1 = int_to_ptr.vmem [resolvable:$true] %s716_s1 }
  0xd3   :  { %813 = vmatprep.subr.bf16.mxu1 %v812_v43  ;;  %v295_v43 = vld [vmem:[#allocation2 + $0x510] sm:$0xff]  ;;  %767 = vmatpush1.bf16.msra.mxu0 %v766_v37  ;;  %v102_v37 = vmul.f32 %v92_v36, %v91_v29  ;;  %v180_v36 = vld [vmem:[#allocation2 + $0x178] sm:$0xff]  ;;  %s1022_s14 = scalar_lea.vmem %s717_s1, 1024  ;;  %p1027_p9 = scmp.lt.s32.totalorder %s717_s1, %s717_s1 }
  0xd4   :  { %815 = vmatpush1.bf16.msra.mxu1 %v814_v51  ;;  %v834_v50 = vpack.c.bf16 %v303_v44, %v295_v43  ;;  %v309_v51 = vld [vmem:[#allocation2 + $0x580] sm:$0xff]  ;;  %769 = vmatprep.subr.bf16.mxu0 %v768_v41  ;;  %v366_v41 = vld [vmem:[#allocation2 + $0x748] sm:$0xff]  ;;  %p1023_p8 = scmp.ne.s32.totalorder %s717_s1, %s1022_s14  ;;  %p1028_p10 = scmp.lt.s32.totalorder %s1022_s14, %s1022_s14 }
  0xd5   :  { %817 = vmatprep.subr.bf16.mxu1 %v816_v55  ;;  %v311_v55 = vld [vmem:[#allocation2 + $0x590] sm:$0xff]  ;;  %v774_v61 = vpack.c.bf16 %v317_v52, %v309_v51  ;;  %v784_v44 = vpack.c.bf16 %v366_v41, %v358_v40  ;;  %v177_v40 = vld [vmem:[#allocation2 + $0x160] sm:$0xff] }
  0xd6   :  { %v838_v62 = vpack.c.bf16 %v319_v56, %v311_v55  ;;  %v367_v51 = vld [vmem:[#allocation2 + $0x750] sm:$0xff]  ;;  %v376_v55 = vld [vmem:[#allocation2 + $0x798] sm:$0xff]  ;;  %p1029_p11 = por %p1028_p10, %p1027_p9 }
  0xd7   :  { %771 = vmatpush1.bf16.msra.mxu0 %v770_v49  ;;  %v786_v49 = vpack.c.bf16 %v365_v47, %v357_v46  ;;  %v852_v60 = vpack.c.bf16 %v384_v57, %v376_v55  ;;  %v194_v46 = vld [vmem:[#allocation2 + $0x1e8] sm:$0xff]  ;;  %v188_v47 = vld [vmem:[#allocation2 + $0x1b8] sm:$0xff]  ;;  %v187_v55 = vld [vmem:[#allocation2 + $0x1b0] sm:$0xff] }
  0xd8   :  { %819 = vmatpush1.bf16.msra.mxu1 %v818_v63  ;;  %v325_v63 = vld [vmem:[#allocation2 + $0x600] sm:$0xff]  ;;  %773 = vmatprep.subr.bf16.mxu0 %v772_v53  ;;  %v374_v53 = vld [vmem:[#allocation2 + $0x788] sm:$0xff]  ;;  %p1030_p12 = pnand %p1029_p11, %p1023_p8 }
  0xd9   :  { %821 = vmatprep.subr.bf16.mxu1 %v820_v3  ;;  %v327_v3 = vld [vmem:[#allocation2 + $0x610] sm:$0xff]  ;;  %v778_v9 = vpack.c.bf16 %v333_v0, %v325_v63  ;;  %v202_v57 = vld [vmem:[#allocation2 + $0x228] sm:$0xff] }
  0xda   :  { %v842_v10 = vpack.c.bf16 %v335_v4, %v327_v3  ;;  %v383_v63 = vld [vmem:[#allocation2 + $0x7d0] sm:$0xff]  ;;  %v140_v3 = vld [vmem:[#allocation2 + $0x38] sm:$0xff] }
  0xdb   :  { %775 = vmatpush1.bf16.msra.mxu0 %v774_v61  ;;  %v790_v61 = vpack.c.bf16 %v381_v59, %v373_v58  ;;  %v920_v6 = vpack.c.bf16 %v148_v5, %v140_v3  ;;  %v210_v58 = vld [vmem:[#allocation2 + $0x268] sm:$0xff]  ;;  %v204_v59 = vld [vmem:[#allocation2 + $0x238] sm:$0xff]  ;;  %v203_v3 = vld [vmem:[#allocation2 + $0x230] sm:$0xff] }
  0xdc   :  { %823 = vmatpush1.bf16.msra.mxu1 %v822_v11  ;;  %v341_v11 = vld [vmem:[#allocation2 + $0x680] sm:$0xff]  ;;  %777 = vmatprep.subr.bf16.mxu0 %v776_v1  ;;  %v138_v1 = vld [vmem:[#allocation2 + $0x28] sm:$0xff] }
  0xdd   :  { %825 = vmatprep.subr.bf16.mxu1 %v824_v15  ;;  %v343_v15 = vld [vmem:[#allocation2 + $0x690] sm:$0xff]  ;;  %v782_v17 = vpack.c.bf16 %v349_v14, %v341_v11  ;;  %v145_v14 = vld [vmem:[#allocation2 + $0x60] sm:$0xff]  ;;  %v218_v5 = vld [vmem:[#allocation2 + $0x2a8] sm:$0xff] }
  0xde   :  { %v846_v18 = vpack.c.bf16 %v351_v16, %v343_v15  ;;  %v139_v15 = vld [vmem:[#allocation2 + $0x30] sm:$0xff] }
  0xdf   :  { %779 = vmatpush1.bf16.msra.mxu0 %v778_v9  ;;  %v147_v16 = vld [vmem:[#allocation2 + $0x70] sm:$0xff] }
  0xe0   :  { %827 = vmatpush1.bf16.msra.mxu1 %v826_v26  ;;  %781 = vmatprep.subr.bf16.mxu0 %v780_v12 }
  0xe1   :  { %829 = vmatprep.subr.bf16.mxu1 %v828_v30  ;;  %v96_v30 = vmul.f32 %v91_v29, %v91_v29  ;;  %v922_v29 = vpack.c.bf16 %v147_v16, %v139_v15  ;;  %v219_v15 = vld [vmem:[#allocation2 + $0x2b0] sm:$0xff] }
  0xe2   :  { %v227_v16 = vld [vmem:[#allocation2 + $0x2f0] sm:$0xff] }
  0xe3   :  { %783 = vmatpush1.bf16.msra.mxu0 %v782_v17 }
  0xe4   :  { %831 = vmatpush1.bf16.msra.mxu1 %v830_v38  ;;  %785 = vmatprep.subr.bf16.mxu0 %v784_v44  ;;  %v179_v44 = vld [vmem:[#allocation2 + $0x170] sm:$0xff] }
  0xe5   :  { %833 = vmatprep.subr.bf16.mxu1 %v832_v42  ;;  %v360_v42 = vld [vmem:[#allocation2 + $0x718] sm:$0xff] }
  0xe6   :  { %v848_v48 = vpack.c.bf16 %v368_v45, %v360_v42  ;;  %v186_v45 = vld [vmem:[#allocation2 + $0x1a8] sm:$0xff] }
  0xe7   :  { %787 = vmatpush1.bf16.msra.mxu0 %v786_v49 }
  0xe8   :  { %835 = vmatpush1.bf16.msra.mxu1 %v834_v50  ;;  %v359_v50 = vld [vmem:[#allocation2 + $0x710] sm:$0xff] }
  0xe9   :  { %837 = vmatprep.subr.bf16.mxu1 %v836_v54  ;;  %v850_v52 = vpack.c.bf16 %v367_v51, %v359_v50  ;;  %v382_v54 = vld [vmem:[#allocation2 + $0x7c8] sm:$0xff]  ;;  %v185_v51 = vld [vmem:[#allocation2 + $0x1a0] sm:$0xff] }
  0xea   :  { %v788_v56 = vpack.c.bf16 %v382_v54, %v374_v53  ;;  %v868_v53 = vpack.c.bf16 %v194_v46, %v186_v45  ;;  %v276_v45 = vld [vmem:[#allocation2 + $0x478] sm:$0xff] }
  0xec   :  { %839 = vmatpush1.bf16.msra.mxu1 %v838_v62  ;;  %v375_v62 = vld [vmem:[#allocation2 + $0x790] sm:$0xff]  ;;  %789 = vmatprep.subr.bf16.mxu0 %v788_v56 }
  0xed   :  { %841 = vmatprep.subr.bf16.mxu1 %v840_v2  ;;  %v854_v0 = vpack.c.bf16 %v383_v63, %v375_v62  ;;  %791 = vmatpush1.bf16.msra.mxu0 %v790_v61  ;;  %v146_v2 = vld [vmem:[#allocation2 + $0x68] sm:$0xff]  ;;  %v195_v56 = vld [vmem:[#allocation2 + $0x1f0] sm:$0xff]  ;;  %v201_v63 = vld [vmem:[#allocation2 + $0x220] sm:$0xff] }
  0xee   :  { %v856_v4 = vpack.c.bf16 %v146_v2, %v138_v1  ;;  %v934_v62 = vpack.c.bf16 %v195_v56, %v187_v55  ;;  %v872_v1 = vpack.c.bf16 %v210_v58, %v202_v57  ;;  %v290_v55 = vld [vmem:[#allocation2 + $0x4e8] sm:$0xff]  ;;  %v284_v56 = vld [vmem:[#allocation2 + $0x4b8] sm:$0xff] }
  0xef   :  { %v292_v57 = vld [vmem:[#allocation2 + $0x4f8] sm:$0xff] }
  0xf0   :  { %843 = vmatpush1.bf16.msra.mxu1 %v842_v10  ;;  %857 = vmatprep.subr.bf16.mxu0 %v856_v4  ;;  %v211_v4 = vld [vmem:[#allocation2 + $0x270] sm:$0xff] }
  0xf1   :  { %845 = vmatprep.subr.bf16.mxu1 %v844_v13  ;;  %v137_v13 = vld [vmem:[#allocation2 + $0x20] sm:$0xff] }
  0xf4   :  { %847 = vmatpush1.bf16.msra.mxu1 %v846_v18 }
  0xf5   :  { %849 = vmatprep.subr.bf16.mxu1 %v848_v48  ;;  %v196_v48 = vld [vmem:[#allocation2 + $0x1f8] sm:$0xff] }
  0xf6   :  { %v932_v54 = vpack.c.bf16 %v196_v48, %v188_v47  ;;  %v265_v48 = vld [vmem:[#allocation2 + $0x420] sm:$0xff] }
  0xf8   :  { %851 = vmatpush1.bf16.msra.mxu1 %v850_v52  ;;  %v193_v52 = vld [vmem:[#allocation2 + $0x1e0] sm:$0xff] }
  0xf9   :  { %853 = vmatprep.subr.bf16.mxu1 %v852_v60  ;;  %v212_v60 = vld [vmem:[#allocation2 + $0x278] sm:$0xff]  ;;  %v870_v61 = vpack.c.bf16 %v193_v52, %v185_v51  ;;  %v267_v52 = vld [vmem:[#allocation2 + $0x430] sm:$0xff] }
  0xfa   :  { %v936_v2 = vpack.c.bf16 %v212_v60, %v204_v59  ;;  %v281_v60 = vld [vmem:[#allocation2 + $0x4a0] sm:$0xff] }
  0xfc   :  { %855 = vmatpush1.bf16.msra.mxu1 %v854_v0  ;;  %v209_v0 = vld [vmem:[#allocation2 + $0x260] sm:$0xff] }
  0xfd   :  { %921 = vmatprep.subr.bf16.mxu1 %v920_v6  ;;  %v226_v6 = vld [vmem:[#allocation2 + $0x2e8] sm:$0xff] }
 0x148   :  { %v81_v20 = vpop.xlane.xlu1 %80 }
 0x149   :  { %v87_v22 = vsel %vm43_vm0, %v81_v20, 0.0  ;;  %v154_v20 = vld [vmem:[#allocation2 + $0xa8] sm:$0xff] }
 0x14c   :  { %v86_v21 = vpop.xlane.xlu1 %85 }
 0x14d   :  { %v88_v25 = vsel %vm43_vm0, %v86_v21, 0.0  ;;  %v162_v21 = vld [vmem:[#allocation2 + $0xe8] sm:$0xff] }
 0x14e   :  { %v89_v26 = vadd.f32 %v88_v25, %v87_v22  ;;  %v156_v22 = vld [vmem:[#allocation2 + $0xb8] sm:$0xff] }
 0x14f   :  { %v164_v25 = vld [vmem:[#allocation2 + $0xf8] sm:$0xff] }
 0x150   :  { %v90_v27 = vmul.f32 0.001953125, %v89_v26  ;;  %v122_v7 = vpop.permute.xlu1 %121 }
 0x151   :  { %v129_v10 = vrot.slane %v122_v7, %v1110_v19  ;;  %v220_v7 = vld [vmem:[#allocation2 + $0x2b8] sm:$0xff] }
 0x152   :  { %v94_v28 = vadd.f32 1e-05, %v90_v27  ;;  %v97_v32 = vmul.f32 %v96_v30, %v90_v27  ;;  %v161_v30 = vld [vmem:[#allocation2 + $0xe0] sm:$0xff] }
 0x154   :  { %996 = vrsqrt.f32 %v94_v28  ;;  %v858_v28 = vpack.c.bf16 %v145_v14, %v137_v13  ;;  %v876_v13 = vpack.c.bf16 %v226_v6, %v218_v5  ;;  %v308_v5 = vld [vmem:[#allocation2 + $0x578] sm:$0xff] }
 0x15e   :  { %v997_v31 = vpop.eup %996 }
 0x15f   :  { %v98_v33 = vmul.f32 %v997_v31, %v997_v31  ;;  %v103_v38 = vmul.f32 %v997_v31, %v102_v37  ;;  %v163_v31 = vld [vmem:[#allocation2 + $0xf0] sm:$0xff] }
 0x161   :  { %v99_v34 = vmul.f32 %v98_v33, %v97_v32  ;;  %v860_v32 = vpack.c.bf16 %v162_v21, %v154_v20  ;;  %v924_v33 = vpack.c.bf16 %v164_v25, %v156_v22  ;;  %v236_v20 = vld [vmem:[#allocation2 + $0x338] sm:$0xff]  ;;  %v942_v25 = vpack.c.bf16 %v227_v16, %v219_v15  ;;  %v322_v15 = vld [vmem:[#allocation2 + $0x5e8] sm:$0xff] }
 0x162   :  { %v244_v21 = vld [vmem:[#allocation2 + $0x378] sm:$0xff] }
 0x163   :  { %v100_v35 = vadd.f32 1e-05, %v99_v34  ;;  %v178_v34 = vld [vmem:[#allocation2 + $0x168] sm:$0xff]  ;;  %v316_v16 = vld [vmem:[#allocation2 + $0x5b8] sm:$0xff] }
 0x165   :  { %998 = vrsqrt.f32 %v100_v35  ;;  %v172_v35 = vld [vmem:[#allocation2 + $0x138] sm:$0xff] }
 0x166   :  { %v928_v42 = vpack.c.bf16 %v180_v36, %v172_v35  ;;  %v249_v36 = vld [vmem:[#allocation2 + $0x3a0] sm:$0xff] }
 0x16f   :  { %v999_v39 = vpop.eup %998 }
 0x170   :  { %v104_v43 = vmul.f32 %v999_v39, %v103_v38  ;;  %v169_v39 = vld [vmem:[#allocation2 + $0x120] sm:$0xff] }
 0x171   :  { %v866_v49 = vpack.c.bf16 %v177_v40, %v169_v39  ;;  %v251_v40 = vld [vmem:[#allocation2 + $0x3b0] sm:$0xff] }
 0x172   :  { %107 = vperm.xlu0 %992, %v104_v43   ;;  %v171_v43 = vld [vmem:[#allocation2 + $0x130] sm:$0xff] }
 0x173   :  { %v930_v50 = vpack.c.bf16 %v179_v44, %v171_v43  ;;  %v274_v43 = vld [vmem:[#allocation2 + $0x468] sm:$0xff]  ;;  %v268_v44 = vld [vmem:[#allocation2 + $0x438] sm:$0xff] }
 0x174   :  { %v952_v51 = vpack.c.bf16 %v276_v45, %v268_v44  ;;  %v345_v45 = vld [vmem:[#allocation2 + $0x6a0] sm:$0xff] }
 0x1f1   :  { %v108_v8 = vpop.permute.xlu0 %107 }
 0x1f2   :  { %v115_v9 = vrot.slane %v108_v8, %v1110_v19  ;;  %v153_v19 = vld [vmem:[#allocation2 + $0xa0] sm:$0xff]  ;;  %v228_v8 = vld [vmem:[#allocation2 + $0x2f8] sm:$0xff] }
 0x1f3   :  { %v862_v37 = vpack.c.bf16 %v161_v30, %v153_v19  ;;  %v940_v14 = vpack.c.bf16 %v228_v8, %v220_v7  ;;  %v944_v19 = vpack.c.bf16 %v244_v21, %v236_v20  ;;  %v235_v30 = vld [vmem:[#allocation2 + $0x330] sm:$0xff]  ;;  %v297_v8 = vld [vmem:[#allocation2 + $0x520] sm:$0xff] }
 0x1f4   :  { %v117_v11 = vmul.f32 %v115_v9, %v1115_v24  ;;  %v118_v12 = vmul.f32 %v115_v9, %v1113_v23  ;;  %v155_v24 = vld [vmem:[#allocation2 + $0xb0] sm:$0xff]  ;;  %v170_v23 = vld [vmem:[#allocation2 + $0x128] sm:$0xff]  ;;  %v874_v9 = vpack.c.bf16 %v209_v0, %v201_v63  ;;  %v956_v63 = vpack.c.bf16 %v292_v57, %v284_v56  ;;  %v313_v21 = vld [vmem:[#allocation2 + $0x5a0] sm:$0xff] }
 0x1f5   :  { %v926_v38 = vpack.c.bf16 %v163_v31, %v155_v24  ;;  %v864_v41 = vpack.c.bf16 %v178_v34, %v170_v23  ;;  %v243_v24 = vld [vmem:[#allocation2 + $0x370] sm:$0xff]  ;;  %v250_v31 = vld [vmem:[#allocation2 + $0x3a8] sm:$0xff]  ;;  %v361_v57 = vld [vmem:[#allocation2 + $0x720] sm:$0xff] }
 0x1f6   :  { %v131_v17 = vadd.f32 %v129_v10, %v117_v11  ;;  %v132_v18 = vadd.f32 %v129_v10, %v118_v12  ;;  %v938_v10 = vpack.c.bf16 %v211_v4, %v203_v3  ;;  %v217_v11 = vld [vmem:[#allocation2 + $0x2a0] sm:$0xff]  ;;  %v258_v23 = vld [vmem:[#allocation2 + $0x3e8] sm:$0xff]  ;;  %v946_v35 = vpack.c.bf16 %v243_v24, %v235_v30  ;;  %v283_v0 = vld [vmem:[#allocation2 + $0x4b0] sm:$0xff] }
 0x1f7   :  { %v225_v12 = vld [vmem:[#allocation2 + $0x2e0] sm:$0xff]  ;;  %v306_v3 = vld [vmem:[#allocation2 + $0x568] sm:$0xff]  ;;  %v300_v4 = vld [vmem:[#allocation2 + $0x538] sm:$0xff] }
 0x1f8   :  { %v1140_v26 = vcombine.low %v131_v17, %v132_v18  ;;  %v392_v27 = vcombine.high %v131_v17, %v132_v18  ;;  %v234_v17 = vld [vmem:[#allocation2 + $0x328] sm:$0xff]  ;;  %v878_v22 = vpack.c.bf16 %v225_v12, %v217_v11  ;;  %v960_v11 = vpack.c.bf16 %v308_v5, %v300_v4  ;;  %v299_v12 = vld [vmem:[#allocation2 + $0x530] sm:$0xff]  ;;  %v332_v24 = vld [vmem:[#allocation2 + $0x638] sm:$0xff] }
 0x1f9   :  { %v242_v18 = vld [vmem:[#allocation2 + $0x368] sm:$0xff]  ;;  %v377_v5 = vld [vmem:[#allocation2 + $0x7a0] sm:$0xff] }
 0x1fa   :  { %459 = vmatprep.mubr.f32.mxu0 %v392_v27  ;;  %530 = vmatprep.mubr.f32.mxu1 %v392_v27  ;;  %v338_v30 = vld [vmem:[#allocation2 + $0x668] sm:$0xff] }
 0x1fb   :  { %460 = vmatmul.mubr.f32.vlgmr.msra.gmra.mrb[0].mxu0 %v1140_v26  ;;  %531 = vmatmul.mubr.f32.vlgmr.msra.gmra.mrb[0].mxu1 %v1140_v26 }
 0x1fc   :  { %859 = vmatpush1.bf16.msra.mxu0 %v858_v28  ;;  %923 = vmatpush1.bf16.msra.mxu1 %v922_v29  ;;  %v241_v28 = vld [vmem:[#allocation2 + $0x360] sm:$0xff]  ;;  %v880_v29 = vpack.c.bf16 %v242_v18, %v234_v17  ;;  %v324_v17 = vld [vmem:[#allocation2 + $0x5f8] sm:$0xff] }
 0x1fd   :  { %601 = vmatprep.mubr.f32.mxu0 %v392_v27  ;;  %672 = vmatprep.mubr.f32.mxu1 %v392_v27  ;;  %v233_v27 = vld [vmem:[#allocation2 + $0x320] sm:$0xff] }
 0x1fe   :  { %861 = vmatprep.subr.bf16.mxu0 %v860_v32  ;;  %925 = vmatprep.subr.bf16.mxu1 %v924_v33  ;;  %v252_v32 = vld [vmem:[#allocation2 + $0x3b8] sm:$0xff]  ;;  %v882_v34 = vpack.c.bf16 %v241_v28, %v233_v27  ;;  %v964_v27 = vpack.c.bf16 %v324_v17, %v316_v16  ;;  %v315_v28 = vld [vmem:[#allocation2 + $0x5b0] sm:$0xff] }
 0x1ff   :  { %v260_v33 = vld [vmem:[#allocation2 + $0x3f8] sm:$0xff] }
 0x200   :  { %863 = vmatpush1.bf16.msra.mxu0 %v862_v37  ;;  %927 = vmatpush1.bf16.msra.mxu1 %v926_v38  ;;  %v257_v37 = vld [vmem:[#allocation2 + $0x3e0] sm:$0xff]  ;;  %v884_v38 = vpack.c.bf16 %v258_v23, %v250_v31  ;;  %v948_v39 = vpack.c.bf16 %v260_v33, %v252_v32  ;;  %v340_v31 = vld [vmem:[#allocation2 + $0x678] sm:$0xff] }
 0x201   :  { %865 = vmatprep.subr.bf16.mxu0 %v864_v41  ;;  %929 = vmatprep.subr.bf16.mxu1 %v928_v42  ;;  %v259_v41 = vld [vmem:[#allocation2 + $0x3f0] sm:$0xff]  ;;  %v266_v42 = vld [vmem:[#allocation2 + $0x428] sm:$0xff]  ;;  %v886_v46 = vpack.c.bf16 %v257_v37, %v249_v36  ;;  %v329_v33 = vld [vmem:[#allocation2 + $0x620] sm:$0xff]  ;;  %v968_v36 = vpack.c.bf16 %v340_v31, %v332_v24 }
 0x202   :  { %v950_v47 = vpack.c.bf16 %v259_v41, %v251_v40  ;;  %v331_v37 = vld [vmem:[#allocation2 + $0x630] sm:$0xff]  ;;  %v354_v40 = vld [vmem:[#allocation2 + $0x6e8] sm:$0xff]  ;;  %v348_v41 = vld [vmem:[#allocation2 + $0x6b8] sm:$0xff] }
 0x204   :  { %867 = vmatpush1.bf16.msra.mxu0 %v866_v49  ;;  %931 = vmatpush1.bf16.msra.mxu1 %v930_v50  ;;  %v273_v49 = vld [vmem:[#allocation2 + $0x460] sm:$0xff]  ;;  %v888_v50 = vpack.c.bf16 %v274_v43, %v266_v42  ;;  %v356_v42 = vld [vmem:[#allocation2 + $0x6f8] sm:$0xff] }
 0x205   :  { %869 = vmatprep.subr.bf16.mxu0 %v868_v53  ;;  %933 = vmatprep.subr.bf16.mxu1 %v932_v54  ;;  %v275_v53 = vld [vmem:[#allocation2 + $0x470] sm:$0xff]  ;;  %v282_v54 = vld [vmem:[#allocation2 + $0x4a8] sm:$0xff]  ;;  %v890_v58 = vpack.c.bf16 %v273_v49, %v265_v48  ;;  %v972_v48 = vpack.c.bf16 %v356_v42, %v348_v41 }
 0x206   :  { %v954_v59 = vpack.c.bf16 %v275_v53, %v267_v52  ;;  %v347_v49 = vld [vmem:[#allocation2 + $0x6b0] sm:$0xff]  ;;  %v370_v52 = vld [vmem:[#allocation2 + $0x768] sm:$0xff]  ;;  %v364_v53 = vld [vmem:[#allocation2 + $0x738] sm:$0xff] }
 0x208   :  { %871 = vmatpush1.bf16.msra.mxu0 %v870_v61  ;;  %935 = vmatpush1.bf16.msra.mxu1 %v934_v62  ;;  %v289_v61 = vld [vmem:[#allocation2 + $0x4e0] sm:$0xff]  ;;  %v892_v62 = vpack.c.bf16 %v290_v55, %v282_v54  ;;  %v372_v54 = vld [vmem:[#allocation2 + $0x778] sm:$0xff] }
 0x209   :  { %873 = vmatprep.subr.bf16.mxu0 %v872_v1  ;;  %937 = vmatprep.subr.bf16.mxu1 %v936_v2  ;;  %v291_v1 = vld [vmem:[#allocation2 + $0x4f0] sm:$0xff]  ;;  %v298_v2 = vld [vmem:[#allocation2 + $0x528] sm:$0xff]  ;;  %v894_v6 = vpack.c.bf16 %v289_v61, %v281_v60  ;;  %v976_v60 = vpack.c.bf16 %v372_v54, %v364_v53 }
 0x20a   :  { %v958_v7 = vpack.c.bf16 %v291_v1, %v283_v0  ;;  %v363_v61 = vld [vmem:[#allocation2 + $0x730] sm:$0xff]  ;;  %v386_v0 = vld [vmem:[#allocation2 + $0x7e8] sm:$0xff]  ;;  %v380_v1 = vld [vmem:[#allocation2 + $0x7b8] sm:$0xff] }
 0x20c   :  { %875 = vmatpush1.bf16.msra.mxu0 %v874_v9  ;;  %939 = vmatpush1.bf16.msra.mxu1 %v938_v10  ;;  %v305_v9 = vld [vmem:[#allocation2 + $0x560] sm:$0xff]  ;;  %v896_v10 = vpack.c.bf16 %v306_v3, %v298_v2  ;;  %v388_v2 = vld [vmem:[#allocation2 + $0x7f8] sm:$0xff] }
 0x20d   :  { %877 = vmatprep.subr.bf16.mxu0 %v876_v13  ;;  %941 = vmatprep.subr.bf16.mxu1 %v940_v14  ;;  %v307_v13 = vld [vmem:[#allocation2 + $0x570] sm:$0xff]  ;;  %v314_v14 = vld [vmem:[#allocation2 + $0x5a8] sm:$0xff]  ;;  %v898_v18 = vpack.c.bf16 %v305_v9, %v297_v8  ;;  %v385_v8 = vld [vmem:[#allocation2 + $0x7e0] sm:$0xff] }
 0x20e   :  { %v962_v20 = vpack.c.bf16 %v307_v13, %v299_v12  ;;  %v379_v9 = vld [vmem:[#allocation2 + $0x7b0] sm:$0xff] }
 0x210   :  { %879 = vmatpush1.bf16.msra.mxu0 %v878_v22  ;;  %943 = vmatpush1.bf16.msra.mxu1 %v942_v25  ;;  %v321_v22 = vld [vmem:[#allocation2 + $0x5e0] sm:$0xff]  ;;  %v900_v25 = vpack.c.bf16 %v322_v15, %v314_v14 }
 0x211   :  { %881 = vmatprep.subr.bf16.mxu0 %v880_v29  ;;  %945 = vmatprep.subr.bf16.mxu1 %v944_v19  ;;  %v323_v29 = vld [vmem:[#allocation2 + $0x5f0] sm:$0xff]  ;;  %v330_v19 = vld [vmem:[#allocation2 + $0x628] sm:$0xff]  ;;  %v902_v23 = vpack.c.bf16 %v321_v22, %v313_v21 }
 0x212   :  { %v966_v32 = vpack.c.bf16 %v323_v29, %v315_v28 }
 0x214   :  { %883 = vmatpush1.bf16.msra.mxu0 %v882_v34  ;;  %947 = vmatpush1.bf16.msra.mxu1 %v946_v35  ;;  %v337_v34 = vld [vmem:[#allocation2 + $0x660] sm:$0xff]  ;;  %v904_v35 = vpack.c.bf16 %v338_v30, %v330_v19 }
 0x215   :  { %885 = vmatprep.subr.bf16.mxu0 %v884_v38  ;;  %949 = vmatprep.subr.bf16.mxu1 %v948_v39  ;;  %v339_v38 = vld [vmem:[#allocation2 + $0x670] sm:$0xff]  ;;  %v346_v39 = vld [vmem:[#allocation2 + $0x6a8] sm:$0xff]  ;;  %v906_v43 = vpack.c.bf16 %v337_v34, %v329_v33 }
 0x216   :  { %v970_v44 = vpack.c.bf16 %v339_v38, %v331_v37 }
 0x218   :  { %887 = vmatpush1.bf16.msra.mxu0 %v886_v46  ;;  %951 = vmatpush1.bf16.msra.mxu1 %v950_v47  ;;  %v353_v46 = vld [vmem:[#allocation2 + $0x6e0] sm:$0xff]  ;;  %v908_v47 = vpack.c.bf16 %v354_v40, %v346_v39 }
 0x219   :  { %889 = vmatprep.subr.bf16.mxu0 %v888_v50  ;;  %953 = vmatprep.subr.bf16.mxu1 %v952_v51  ;;  %v355_v50 = vld [vmem:[#allocation2 + $0x6f0] sm:$0xff]  ;;  %v362_v51 = vld [vmem:[#allocation2 + $0x728] sm:$0xff]  ;;  %v910_v55 = vpack.c.bf16 %v353_v46, %v345_v45 }
 0x21a   :  { %v974_v56 = vpack.c.bf16 %v355_v50, %v347_v49 }
 0x21c   :  { %891 = vmatpush1.bf16.msra.mxu0 %v890_v58  ;;  %955 = vmatpush1.bf16.msra.mxu1 %v954_v59  ;;  %v369_v58 = vld [vmem:[#allocation2 + $0x760] sm:$0xff]  ;;  %v912_v59 = vpack.c.bf16 %v370_v52, %v362_v51 }
 0x21d   :  { %893 = vmatprep.subr.bf16.mxu0 %v892_v62  ;;  %957 = vmatprep.subr.bf16.mxu1 %v956_v63  ;;  %v371_v62 = vld [vmem:[#allocation2 + $0x770] sm:$0xff]  ;;  %v378_v63 = vld [vmem:[#allocation2 + $0x7a8] sm:$0xff]  ;;  %v914_v3 = vpack.c.bf16 %v369_v58, %v361_v57 }
 0x21e   :  { %v978_v4 = vpack.c.bf16 %v371_v62, %v363_v61 }
 0x220   :  { %895 = vmatpush1.bf16.msra.mxu0 %v894_v6  ;;  %959 = vmatpush1.bf16.msra.mxu1 %v958_v7  ;;  %v916_v6 = vpack.c.bf16 %v386_v0, %v378_v63  ;;  %v980_v7 = vpack.c.bf16 %v388_v2, %v380_v1 }
 0x221   :  { %897 = vmatprep.subr.bf16.mxu0 %v896_v10  ;;  %961 = vmatprep.subr.bf16.mxu1 %v960_v11  ;;  %v387_v10 = vld [vmem:[#allocation2 + $0x7f0] sm:$0xff]  ;;  %v918_v11 = vpack.c.bf16 %v385_v8, %v377_v5 }
 0x222   :  { %v982_v12 = vpack.c.bf16 %v387_v10, %v379_v9 }
 0x224   :  { %899 = vmatpush1.bf16.msra.mxu0 %v898_v18  ;;  %963 = vmatpush1.bf16.msra.mxu1 %v962_v20 }
 0x225   :  { %901 = vmatprep.subr.bf16.mxu0 %v900_v25  ;;  %965 = vmatprep.subr.bf16.mxu1 %v964_v27 }
 0x228   :  { %903 = vmatpush1.bf16.msra.mxu0 %v902_v23  ;;  %967 = vmatpush1.bf16.msra.mxu1 %v966_v32 }
 0x229   :  { %905 = vmatprep.subr.bf16.mxu0 %v904_v35  ;;  %969 = vmatprep.subr.bf16.mxu1 %v968_v36 }
 0x22c   :  { %907 = vmatpush1.bf16.msra.mxu0 %v906_v43  ;;  %971 = vmatpush1.bf16.msra.mxu1 %v970_v44 }
 0x22d   :  { %909 = vmatprep.subr.bf16.mxu0 %v908_v47  ;;  %973 = vmatprep.subr.bf16.mxu1 %v972_v48 }
 0x230   :  { %911 = vmatpush1.bf16.msra.mxu0 %v910_v55  ;;  %975 = vmatpush1.bf16.msra.mxu1 %v974_v56 }
 0x231   :  { %913 = vmatprep.subr.bf16.mxu0 %v912_v59  ;;  %977 = vmatprep.subr.bf16.mxu1 %v976_v60 }
 0x234   :  { %915 = vmatpush1.bf16.msra.mxu0 %v914_v3  ;;  %979 = vmatpush1.bf16.msra.mxu1 %v978_v4 }
 0x235   :  { %917 = vmatprep.subr.bf16.mxu0 %v916_v6  ;;  %981 = vmatprep.subr.bf16.mxu1 %v980_v7 }
 0x238   :  { %919 = vmatpush1.bf16.msra.mxu0 %v918_v11  ;;  %983 = vmatpush1.bf16.msra.mxu1 %v982_v12 }
 0x23b   :  { %602 = vmatmul.mubr.f32.vlgmr.msra.gmra.mrb[2].mxu0 %v1140_v26  ;;  %673 = vmatmul.mubr.f32.vlgmr.msra.gmra.mrb[2].mxu1 %v1140_v26 }
 0x2ce   :  { %v461_v13 = vpop.f32.mrb[0].mxu0  ;;  %v532_v14 = vpop.f32.mrb[0].mxu1 }
 0x2cf   :  { %v463_v15 = vpop.f32.mrb[1].mxu0  ;;  %v534_v16 = vpop.f32.mrb[1].mxu1 }
 0x2d0   :  { %v687_v17 = vcombine.low %v461_v13, %v463_v15  ;;  %v688_v18 = vcombine.high %v461_v13, %v463_v15  ;;  %v689_v20 = vcombine.low %v532_v14, %v534_v16  ;;  %v690_v21 = vcombine.high %v532_v14, %v534_v16 }
 0x2d2   :  { %703 = vst [vmem:[#allocation5] sm:$0xff] %v687_v17  ;;  %707 = vst [vmem:[#allocation5 + $0x20] sm:$0xff] %v688_v18 }
 0x2d3   :  { %704 = vst [vmem:[#allocation5 + $0x8] sm:$0xff] %v689_v20  ;;  %708 = vst [vmem:[#allocation5 + $0x28] sm:$0xff] %v690_v21 }
 0x30e   :  { %v603_v22 = vpop.f32.mrb[2].mxu0  ;;  %v674_v25 = vpop.f32.mrb[2].mxu1 }
 0x30f   :  { %v605_v27 = vpop.f32.mrb[3].mxu0  ;;  %v676_v28 = vpop.f32.mrb[3].mxu1 }
 0x310   :  { %v691_v26 = vcombine.low %v603_v22, %v605_v27  ;;  %v692_v29 = vcombine.high %v603_v22, %v605_v27  ;;  %v693_v19 = vcombine.low %v674_v25, %v676_v28  ;;  %v694_v30 = vcombine.high %v674_v25, %v676_v28 }
 0x312   :  { %705 = vst [vmem:[#allocation5 + $0x10] sm:$0xff] %v691_v26  ;;  %709 = vst [vmem:[#allocation5 + $0x30] sm:$0xff] %v692_v29 }
 0x313   :  { %706 = vst [vmem:[#allocation5 + $0x18] sm:$0xff] %v693_v19  ;;  %710 = vst [vmem:[#allocation5 + $0x38] sm:$0xff] %v694_v30 }
 0x314   :  { %1033 = shalt.err (!%p1030_p12)
}
 0x315   :  { %s1034_s17 = scalar_lea.hbm %s1163_s5, 1024 }
 0x316   :  { %p1035_p13 = scmp.ne.s32.totalorder %s1163_s5, %s1034_s17  ;;  %p1038_p0 = scmp.lt.u32.totalorder %s1034_s17, %s1163_s5 }
 0x318   :  { %p1040_p1 = pnand %p1038_p0, %p1035_p13 }
 0x31a   :  { %1043 = shalt.err (!%p1040_p1)
}
 0x31b   :  { %s1054_s22 = smov 512   ;;  %s1055_s23 = smov 32  }
 0x31c   :  { %722 = dma.vmem_to_hbm [thread:$0]  %s717_s1, 1024, %s1163_s5, [#allocation4], %s1054_s22, %s1054_s22, %s1055_s23  }
 0x31d   :  { %1046 = dma.done.wait [#allocation4], 1024  }
 0x31e   :  { %1047 = vsyncadd [#allocation4], 4294966272 }
 0x31f   :  { %726 = vsyncpa [#allocation3], 1 }
 0x320   :  { %727 = vsyncpa [#allocation4], 1 }

</bundles_post_ra>
